<compile_context>
chip_gen: v7x
topology: tpu7x:2x2x1
jax: 0.10.0
libtpu: 0.0.40
codegen_flags: <defaults>
</compile_context>

<pallas_src>
import jax
import jax.numpy as jnp
from jax import lax
from jax.experimental import pallas as pl
from jax.experimental.pallas import tpu as pltpu

_LANE = 128


def _make_channel_attention_kernel(n_tile, n_chunks, hw_tile, inv_hw,
                                   hw_valid, needs_mask, unroll):
    """Kernel body for fixed static tiling parameters."""

    def kernel(x_ref, w1_ref, w2_ref, o_ref, sum_acc, max_acc):
        # x_ref:   (n_tile, C, hw_tile)        current batch/spatial tile
        # w1_ref:  (C, C_hid), w2_ref: (C_hid, C)  weights (VMEM resident)
        # o_ref:   (n_tile, C)                 sigmoid attention weights
        # sum_acc: (n_tile, C, 128) f32        running per-lane partial sums
        # max_acc: (n_tile, C, 128) x.dtype    running per-lane partial maxes
        hw = pl.program_id(1)

        @pl.when(hw == 0)
        def _init():
            sum_acc[...] = jnp.zeros_like(sum_acc)
            max_acc[...] = jnp.full_like(max_acc, -jnp.inf)

        def body(k, carry):
            start = pl.multiple_of(k * _LANE, _LANE)
            chunk = x_ref[:, :, pl.ds(start, _LANE)]
            # In-place VPU accumulation: live values per iteration are ~one
            # chunk's worth of vregs, so nothing spills.
            sum_acc[...] += chunk.astype(jnp.float32)
            if needs_mask:
                # Padded lanes were zero-filled (neutral for sum); mask them
                # out of the max with -inf.
                pos = (hw * hw_tile + k * _LANE
                       + lax.broadcasted_iota(jnp.int32, chunk.shape, 2))
                chunk = jnp.where(pos < hw_valid, chunk,
                                  jnp.full_like(chunk, -jnp.inf))
            max_acc[...] = jnp.maximum(max_acc[...], chunk)
            return carry

        lax.fori_loop(0, n_chunks, body, None, unroll=unroll)

        @pl.when(hw == pl.num_programs(1) - 1)
        def _finalize():
            # Single cross-lane (XLU) reduce over the 128-wide partials.
            avg = jnp.sum(sum_acc[...], axis=-1) * inv_hw              # (n_tile, C)
            mx = jnp.max(max_acc[...], axis=-1).astype(jnp.float32)    # (n_tile, C)

            # Fuse the avg/max branches: one MXU dot per layer on stacked rows.
            pooled = jnp.concatenate([avg, mx], axis=0)                # (2*n_tile, C)
            w1 = w1_ref[...].astype(jnp.float32)                       # (C, C_hid)
            w2 = w2_ref[...].astype(jnp.float32)                       # (C_hid, C)
            hid = jnp.maximum(
                jnp.dot(pooled, w1, preferred_element_type=jnp.float32), 0.0)
            out = jnp.dot(hid, w2, preferred_element_type=jnp.float32)
            out = out[:n_tile] + out[n_tile:]
            o_ref[...] = jax.nn.sigmoid(out).astype(o_ref.dtype)

    return kernel


def _round_up(a, b):
    return -(-a // b) * b


def _default_vmem_limit():
    """Generation-aware scoped-VMEM request (3/4 of physical, capped)."""
    try:
        cap = pltpu.get_tpu_info().vmem_capacity_bytes
    except Exception:
        cap = 64 * 1024 * 1024          # conservative (v7x per-TensorCore)
    return min(int(cap) * 3 // 4, 96 * 1024 * 1024)


def _pick_hw_tile(hw_pad, n_tile, C, c_hid, x_itemsize, w_itemsize,
                  out_itemsize, vmem_limit_bytes, max_hw_tile):
    """Largest lane-aligned divisor of hw_pad whose full VMEM footprint fits."""
    budget = int(vmem_limit_bytes * 0.8)
    # Resident bytes that do NOT scale with hw_tile (scratch scales with C!).
    fixed = (n_tile * C * _LANE * 4                  # f32 sum scratch
             + n_tile * C * _LANE * x_itemsize       # max scratch (x dtype)
             + 2 * 2 * C * c_hid * w_itemsize        # weights (double-buffered)
             + 2 * n_tile * C * out_itemsize)        # output buffers
    per_lane = 2 * n_tile * C * x_itemsize           # x block, double-buffered
    avail = max(budget - fixed, per_lane * _LANE)
    max_lanes = max(_LANE, (avail // per_lane) // _LANE * _LANE)
    max_lanes = min(max_lanes, max_hw_tile, hw_pad)

    best = _LANE
    t = _LANE
    while t <= hw_pad:
        if hw_pad % t == 0 and t <= max_lanes:
            best = t
        t += _LANE
    return best


def channel_attention(x, w1, w2, *, n_tile=None, hw_tile=None,
                      vmem_limit_bytes=None, max_hw_tile=8192):
    """x: (N, C, H, W) NCHW.  w1: (C_hid, C) fc1 weight, w2: (C, C_hid) fc2 weight.

    Returns sigmoid attention weights of shape (N, C, 1, 1), matching PyTorch.
    """
    N, C, H, W = x.shape
    c_hid = w1.shape[0]
    assert w1.shape == (c_hid, C) and w2.shape == (C, c_hid)
    assert jnp.issubdtype(x.dtype, jnp.floating)
    HW = H * W

    if vmem_limit_bytes is None:
        vmem_limit_bytes = _default_vmem_limit()

    if n_tile is None:
        # Output block (n_tile, C): second-to-last dim must be a multiple of 8
        # or equal N.  n_tile=8 keeps >=2 programs on the parallel batch axis
        # (megacore sharding on v7x) whenever N >= 16.
        # TODO(synk): for batch <= 8 on v7x, split the HW reduction across the
        # two TensorCores (per-core partials + combine) instead of relying on
        # the batch axis for parallelism.
        n_tile = 8 if (N % 8 == 0) else N
    assert N % n_tile == 0 and (n_tile == N or n_tile % 8 == 0)

    # Pad the spatial extent to a multiple of 128 so the streaming/pipelined
    # path is used for every shape (zero pad: neutral for sum, re-masked for max).
    hw_pad = _round_up(HW, _LANE)
    needs_mask = hw_pad != HW

    if hw_tile is None:
        hw_tile = _pick_hw_tile(hw_pad, n_tile, C, c_hid,
                                x.dtype.itemsize, w1.dtype.itemsize,
                                x.dtype.itemsize, vmem_limit_bytes, max_hw_tile)
    assert hw_pad % hw_tile == 0 and hw_tile % _LANE == 0

    x3 = x.reshape(N, C, HW)
    if needs_mask:
        x3 = jnp.pad(x3, ((0, 0), (0, 0), (0, hw_pad - HW)))

    w1t = jnp.transpose(w1)          # (C, C_hid)
    w2t = jnp.transpose(w2)          # (C_hid, C)

    n_chunks = hw_tile // _LANE
    unroll = n_chunks if n_chunks <= 8 else 8
    inv_hw = 1.0 / float(HW)

    grid = (N // n_tile, hw_pad // hw_tile)
    kernel = _make_channel_attention_kernel(
        n_tile, n_chunks, hw_tile, inv_hw, HW, needs_mask, unroll)

    # TODO(synk): output last dim is C (<128 at toy shapes) -> masked stores;
    # fires once per batch tile so it is negligible; pad C for production shapes.
    out = pl.pallas_call(
        kernel,
        out_shape=jax.ShapeDtypeStruct((N, C), x.dtype),
        grid_spec=pltpu.PrefetchScalarGridSpec(
            num_scalar_prefetch=0,
            grid=grid,
            in_specs=[
                pl.BlockSpec((n_tile, C, hw_tile), lambda n, h: (n, 0, h)),
                # Constant index_maps: weights DMA'd once, VMEM-resident.
                pl.BlockSpec((C, c_hid), lambda n, h: (0, 0)),
                pl.BlockSpec((c_hid, C), lambda n, h: (0, 0)),
            ],
            out_specs=pl.BlockSpec((n_tile, C), lambda n, h: (n, 0)),
            scratch_shapes=[
                pltpu.VMEM((n_tile, C, _LANE), jnp.float32),   # sum partials (f32)
                pltpu.VMEM((n_tile, C, _LANE), x.dtype),       # max partials (exact)
            ],
        ),
        compiler_params=pltpu.CompilerParams(
            dimension_semantics=("parallel", "arbitrary"),
            vmem_limit_bytes=vmem_limit_bytes,
        ),
    )(x3, w1t, w2t)

    return out.reshape(N, C, 1, 1)


def reference(x, w1, w2):
    # Pure-JAX reference mirroring the PyTorch module.
    avg = jnp.mean(x, axis=(2, 3))                                   # (N, C)
    mx = jnp.max(x, axis=(2, 3))                                     # (N, C)

    def branch(p):
        h = jnp.maximum(p @ w1.T, 0.0)                               # (N, C_hid)
        return h @ w2.T                                              # (N, C)

    out = jax.nn.sigmoid(branch(avg) + branch(mx))
    return out.reshape(x.shape[0], x.shape[1], 1, 1)


if __name__ == "__main__":
    key = jax.random.PRNGKey(0)
    kx, k1, k2, kx2 = jax.random.split(key, 4)

    N, C, H, W = 2, 64, 16, 16           # in_planes=64 -> hidden = 64 // 16 = 4
    C_hid = C // 16

    x = jax.random.normal(kx, (N, C, H, W), dtype=jnp.float32)
    # Deterministic kaiming-style init for the 1x1 conv weights (no bias).
    w1 = jax.random.normal(k1, (C_hid, C), dtype=jnp.float32) * (2.0 / C) ** 0.5
    w2 = jax.random.normal(k2, (C, C_hid), dtype=jnp.float32) * (2.0 / C_hid) ** 0.5

    ref = reference(x, w1, w2)

    # Auto-picked tiling (single HW step at this toy shape).
    out = jax.block_until_ready(channel_attention(x, w1, w2))
    assert out.shape == (N, C, 1, 1)
    assert jnp.allclose(out, ref, atol=1e-5, rtol=1e-5)

    # Explicit hw_tile=128 exercises the multi-step accumulate-across-grid path.
    out2 = jax.block_until_ready(channel_attention(x, w1, w2, hw_tile=128))
    assert jnp.allclose(out2, ref, atol=1e-5, rtol=1e-5)

    # Non-128-divisible spatial extent exercises the padded/masked path
    # (all-negative values make sure the padded zeros don't leak into the max).
    xo = jax.random.normal(kx2, (N, C, 9, 9), dtype=jnp.float32) - 5.0
    out3 = jax.block_until_ready(channel_attention(xo, w1, w2))
    assert jnp.allclose(out3, reference(xo, w1, w2), atol=1e-5, rtol=1e-5)

    print("KERNEL_OK")
</pallas_src>

<mosaic_0001>
module attributes {stable_mosaic.version = 11 : i64} {
  func.func @kernel(%arg0: i32, %arg1: i32, %arg2: memref<2x64x256xf32, #tpu.memory_space<vmem>>, %arg3: memref<64x4xf32, #tpu.memory_space<vmem>>, %arg4: memref<4x64xf32, #tpu.memory_space<vmem>>, %arg5: memref<2x64xf32, #tpu.memory_space<vmem>>, %arg6: memref<2x64x128xf32, #tpu.memory_space<vmem>>, %arg7: memref<2x64x128xf32, #tpu.memory_space<vmem>>) attributes {dimension_semantics = [#tpu.dimension_semantics<parallel>, #tpu.dimension_semantics<arbitrary>], iteration_bounds = array<i64: 1, 1>, scalar_prefetch = 0 : i64, scratch_operands = 2 : i64, tpu.core_type = #tpu.core_type<tc>, window_params = [{transform_indices = @transform_0, window_bounds = array<i64: 2, 64, 256>}, {pipeline_mode = #tpu.pipeline_mode<synchronous>, transform_indices = @transform_1, window_bounds = array<i64: 64, 4>}, {pipeline_mode = #tpu.pipeline_mode<synchronous>, transform_indices = @transform_2, window_bounds = array<i64: 4, 64>}, {transform_indices = @transform_3, window_bounds = array<i64: 2, 64>}]} {
    %c0_i32 = arith.constant 0 : i32
    %0 = arith.cmpi eq, %arg1, %c0_i32 : i32
    %1 = arith.extui %0 : i1 to i32
    %c0_i32_0 = arith.constant 0 : i32
    %2 = arith.cmpi ne, %1, %c0_i32_0 : i32
    scf.if %2 {
      %cst = arith.constant 0.000000e+00 : f32
      %26 = vector.broadcast %cst : f32 to vector<2x64x128xf32>
      %c0_32 = arith.constant 0 : index
      %c0_33 = arith.constant 0 : index
      %c0_34 = arith.constant 0 : index
      %27 = vector.load %arg6[%c0_32, %c0_33, %c0_34] : memref<2x64x128xf32, #tpu.memory_space<vmem>>, vector<2x64x128xf32>
      tpu.vector_store %arg6[%c0_32, %c0_33, %c0_34], %26 {strides = array<i32>} : memref<2x64x128xf32, #tpu.memory_space<vmem>>, vector<2x64x128xf32>,
      %cst_35 = arith.constant 0xFF800000 : f32
      %28 = vector.broadcast %cst_35 : f32 to vector<2x64x128xf32>
      %c0_36 = arith.constant 0 : index
      %c0_37 = arith.constant 0 : index
      %c0_38 = arith.constant 0 : index
      %29 = vector.load %arg7[%c0_36, %c0_37, %c0_38] : memref<2x64x128xf32, #tpu.memory_space<vmem>>, vector<2x64x128xf32>
      tpu.vector_store %arg7[%c0_36, %c0_37, %c0_38], %28 {strides = array<i32>} : memref<2x64x128xf32, #tpu.memory_space<vmem>>, vector<2x64x128xf32>,
    } else {
    }
    %c0_i32_1 = arith.constant 0 : i32
    %c128_i32 = arith.constant 128 : i32
    %3 = arith.muli %c0_i32_1, %c128_i32 : i32
    %4 = tpu.assume_multiple %3, 128 : i32
    %c0 = arith.constant 0 : index
    %c0_2 = arith.constant 0 : index
    %5 = arith.index_cast %4 : i32 to index
    %6 = vector.load %arg2[%c0, %c0_2, %5] : memref<2x64x256xf32, #tpu.memory_space<vmem>>, vector<2x64x128xf32>
    %c0_3 = arith.constant 0 : index
    %c0_4 = arith.constant 0 : index
    %c0_5 = arith.constant 0 : index
    %7 = vector.load %arg6[%c0_3, %c0_4, %c0_5] : memref<2x64x128xf32, #tpu.memory_space<vmem>>, vector<2x64x128xf32>
    %8 = arith.addf %7, %6 : vector<2x64x128xf32>
    %c0_6 = arith.constant 0 : index
    %c0_7 = arith.constant 0 : index
    %c0_8 = arith.constant 0 : index
    %9 = vector.load %arg6[%c0_6, %c0_7, %c0_8] : memref<2x64x128xf32, #tpu.memory_space<vmem>>, vector<2x64x128xf32>
    tpu.vector_store %arg6[%c0_6, %c0_7, %c0_8], %8 {strides = array<i32>} : memref<2x64x128xf32, #tpu.memory_space<vmem>>, vector<2x64x128xf32>,
    %c0_9 = arith.constant 0 : index
    %c0_10 = arith.constant 0 : index
    %c0_11 = arith.constant 0 : index
    %10 = vector.load %arg7[%c0_9, %c0_10, %c0_11] : memref<2x64x128xf32, #tpu.memory_space<vmem>>, vector<2x64x128xf32>
    %11 = arith.maximumf %10, %6 : vector<2x64x128xf32>
    %c0_12 = arith.constant 0 : index
    %c0_13 = arith.constant 0 : index
    %c0_14 = arith.constant 0 : index
    %12 = vector.load %arg7[%c0_12, %c0_13, %c0_14] : memref<2x64x128xf32, #tpu.memory_space<vmem>>, vector<2x64x128xf32>
    tpu.vector_store %arg7[%c0_12, %c0_13, %c0_14], %11 {strides = array<i32>} : memref<2x64x128xf32, #tpu.memory_space<vmem>>, vector<2x64x128xf32>,
    %c1_i32 = arith.constant 1 : i32
    %c128_i32_15 = arith.constant 128 : i32
    %13 = arith.muli %c1_i32, %c128_i32_15 : i32
    %14 = tpu.assume_multiple %13, 128 : i32
    %c0_16 = arith.constant 0 : index
    %c0_17 = arith.constant 0 : index
    %15 = arith.index_cast %14 : i32 to index
    %16 = vector.load %arg2[%c0_16, %c0_17, %15] : memref<2x64x256xf32, #tpu.memory_space<vmem>>, vector<2x64x128xf32>
    %c0_18 = arith.constant 0 : index
    %c0_19 = arith.constant 0 : index
    %c0_20 = arith.constant 0 : index
    %17 = vector.load %arg6[%c0_18, %c0_19, %c0_20] : memref<2x64x128xf32, #tpu.memory_space<vmem>>, vector<2x64x128xf32>
    %18 = arith.addf %17, %16 : vector<2x64x128xf32>
    %c0_21 = arith.constant 0 : index
    %c0_22 = arith.constant 0 : index
    %c0_23 = arith.constant 0 : index
    %19 = vector.load %arg6[%c0_21, %c0_22, %c0_23] : memref<2x64x128xf32, #tpu.memory_space<vmem>>, vector<2x64x128xf32>
    tpu.vector_store %arg6[%c0_21, %c0_22, %c0_23], %18 {strides = array<i32>} : memref<2x64x128xf32, #tpu.memory_space<vmem>>, vector<2x64x128xf32>,
    %c0_24 = arith.constant 0 : index
    %c0_25 = arith.constant 0 : index
    %c0_26 = arith.constant 0 : index
    %20 = vector.load %arg7[%c0_24, %c0_25, %c0_26] : memref<2x64x128xf32, #tpu.memory_space<vmem>>, vector<2x64x128xf32>
    %21 = arith.maximumf %20, %16 : vector<2x64x128xf32>
    %c0_27 = arith.constant 0 : index
    %c0_28 = arith.constant 0 : index
    %c0_29 = arith.constant 0 : index
    %22 = vector.load %arg7[%c0_27, %c0_28, %c0_29] : memref<2x64x128xf32, #tpu.memory_space<vmem>>, vector<2x64x128xf32>
    tpu.vector_store %arg7[%c0_27, %c0_28, %c0_29], %21 {strides = array<i32>} : memref<2x64x128xf32, #tpu.memory_space<vmem>>, vector<2x64x128xf32>,
    %c2_i32 = arith.constant 2 : i32
    %c0_i32_30 = arith.constant 0 : i32
    %23 = arith.cmpi eq, %arg1, %c0_i32_30 : i32
    %24 = arith.extui %23 : i1 to i32
    %c0_i32_31 = arith.constant 0 : i32
    %25 = arith.cmpi ne, %24, %c0_i32_31 : i32
    scf.if %25 {
      %c0_32 = arith.constant 0 : index
      %c0_33 = arith.constant 0 : index
      %c0_34 = arith.constant 0 : index
      %26 = vector.load %arg6[%c0_32, %c0_33, %c0_34] : memref<2x64x128xf32, #tpu.memory_space<vmem>>, vector<2x64x128xf32>
      %cst = arith.constant dense<0.000000e+00> : vector<2x64xf32>
      %27 = vector.multi_reduction <add>, %26, %cst [2] : vector<2x64x128xf32> to vector<2x64xf32>
      %cst_35 = arith.constant 3.906250e-03 : f32
      %28 = vector.broadcast %cst_35 : f32 to vector<2x64xf32>
      %29 = arith.mulf %27, %28 : vector<2x64xf32>
      %c0_36 = arith.constant 0 : index
      %c0_37 = arith.constant 0 : index
      %c0_38 = arith.constant 0 : index
      %30 = vector.load %arg7[%c0_36, %c0_37, %c0_38] : memref<2x64x128xf32, #tpu.memory_space<vmem>>, vector<2x64x128xf32>
      %cst_39 = arith.constant dense<0xFF800000> : vector<2x64xf32>
      %31 = vector.multi_reduction <maximumf>, %30, %cst_39 [2] : vector<2x64x128xf32> to vector<2x64xf32>
      %32 = tpu.concatenate %29, %31 in 0 : vector<2x64xf32>, vector<2x64xf32> -> vector<4x64xf32>
      %c0_40 = arith.constant 0 : index
      %c0_41 = arith.constant 0 : index
      %33 = vector.load %arg3[%c0_40, %c0_41] : memref<64x4xf32, #tpu.memory_space<vmem>>, vector<64x4xf32>
      %c0_42 = arith.constant 0 : index
      %c0_43 = arith.constant 0 : index
      %34 = vector.load %arg4[%c0_42, %c0_43] : memref<4x64xf32, #tpu.memory_space<vmem>>, vector<4x64xf32>
      %cst_44 = arith.constant dense<0.000000e+00> : vector<4x4xf32>
      %35 = tpu.matmul %32, %33, %cst_44 {dimension_numbers = #tpu.dot_dimension_numbers<[1], [0], [0], [1], [0, 0, 1, 1], [], []>} : vector<4x64xf32>, vector<64x4xf32>, vector<4x4xf32> -> vector<4x4xf32>
      %cst_45 = arith.constant 0.000000e+00 : f32
      %36 = vector.broadcast %cst_45 : f32 to vector<4x4xf32>
      %37 = arith.maximumf %35, %36 : vector<4x4xf32>
      %cst_46 = arith.constant dense<0.000000e+00> : vector<4x64xf32>
      %38 = tpu.matmul %37, %34, %cst_46 {dimension_numbers = #tpu.dot_dimension_numbers<[1], [0], [0], [1], [0, 0, 1, 1], [], []>} : vector<4x4xf32>, vector<4x64xf32>, vector<4x64xf32> -> vector<4x64xf32>
      %39 = vector.extract_strided_slice %38 {offsets = [0, 0], sizes = [2, 64], strides = [1, 1]} : vector<4x64xf32> to vector<2x64xf32>
      %40 = vector.extract_strided_slice %38 {offsets = [2, 0], sizes = [2, 64], strides = [1, 1]} : vector<4x64xf32> to vector<2x64xf32>
      %41 = arith.addf %39, %40 : vector<2x64xf32>
      %42 = arith.negf %41 : vector<2x64xf32>
      %43 = math.exp %42 : vector<2x64xf32>
      %cst_47 = arith.constant 1.000000e+00 : f32
      %44 = vector.broadcast %cst_47 : f32 to vector<2x64xf32>
      %45 = arith.addf %44, %43 : vector<2x64xf32>
      %46 = arith.divf %44, %45 : vector<2x64xf32>
      %c0_48 = arith.constant 0 : index
      %c0_49 = arith.constant 0 : index
      %47 = vector.load %arg5[%c0_48, %c0_49] : memref<2x64xf32, #tpu.memory_space<vmem>>, vector<2x64xf32>
      tpu.vector_store %arg5[%c0_48, %c0_49], %46 {strides = array<i32>} : memref<2x64xf32, #tpu.memory_space<vmem>>, vector<2x64xf32>,
    } else {
    }
    return
  }
  func.func @transform_0(%arg0: i32, %arg1: i32) -> (i32, i32, i32) {
    %c0_i32 = arith.constant 0 : i32
    %c0_i32_0 = arith.constant 0 : i32
    return %arg0, %c0_i32, %arg1 : i32, i32, i32
  }
  func.func @transform_1(%arg0: i32, %arg1: i32) -> (i32, i32) {
    %c0_i32 = arith.constant 0 : i32
    %c0_i32_0 = arith.constant 0 : i32
    %c0_i32_1 = arith.constant 0 : i32
    return %c0_i32, %c0_i32_0 : i32, i32
  }
  func.func @transform_2(%arg0: i32, %arg1: i32) -> (i32, i32) {
    %c0_i32 = arith.constant 0 : i32
    %c0_i32_0 = arith.constant 0 : i32
    %c0_i32_1 = arith.constant 0 : i32
    return %c0_i32, %c0_i32_0 : i32, i32
  }
  func.func @transform_3(%arg0: i32, %arg1: i32) -> (i32, i32) {
    %c0_i32 = arith.constant 0 : i32
    %c0_i32_0 = arith.constant 0 : i32
    return %arg0, %c0_i32 : i32, i32
  }
}

</mosaic_0001>

<bundles_post_ra>
// kernel: tpu_custom_call.1
= control target key start
LH: loop header
LB: loop body
LE: loop exit
PB: predicated region body
PF: predicated region fallthrough
CT: control target
= control target key end

     0   :  { %8 = vsyncpa [#allocation5], 0  ;;  %s1102_s0 = inlined_call_operand.hbm [shape: f32[2,64,256], index: 0, kind: input, shape index: {}]   ;;  %s1103_s1 = inlined_call_operand.vmem [shape: f32[64,4], index: 1, kind: input, shape index: {}]   ;;  %s1104_s2 = inlined_call_operand.vmem [shape: f32[4,64], index: 2, kind: input, shape index: {}]   ;;  %s1105_s3 = inlined_call_operand.hbm [shape: f32[2,64], index: 3, kind: output, shape index: {}]  }
   0x1   :  { %9 = vsyncpa [#allocation6], 0  ;;  %s916_s12 = smov [#allocation4]   ;;  %s868_s16 = scalar_lea.hbm %s1102_s0, 4096 }
   0x2   :  { %s15_s13 = sshll.u32 %s916_s12, 4  ;;  %p869_p0 = scmp.ne.s32.totalorder %s1102_s0, %s868_s16  ;;  %s16_s13 = int_to_ptr.vmem [resolvable:$true] %s15_s13 }
   0x3   :  { %p872_p1 = scmp.lt.u32.totalorder %s868_s16, %s1102_s0 }
   0x5   :  { %p874_p2 = pnand %p872_p1, %p869_p0 }
   0x7   :  { %877 = shalt.err (!%p874_p2)
}
   0x8   :  { %s878_s21 = scalar_lea.vmem %s16_s13, 4096  ;;  %p883_p4 = scmp.lt.s32.totalorder %s16_s13, %s16_s13 }
   0x9   :  { %p879_p3 = scmp.ne.s32.totalorder %s16_s13, %s878_s21  ;;  %p884_p5 = scmp.lt.s32.totalorder %s878_s21, %s878_s21 }
   0xb   :  { %p885_p6 = por %p884_p5, %p883_p4 }
   0xd   :  { %p886_p7 = pnand %p885_p6, %p879_p3 }
   0xf   :  { %889 = shalt.err (!%p886_p7)
}
  0x10   :  { %s917_s22 = smov 256   ;;  %s918_s23 = smov 16  }
  0x11   :  { %21 = dma.hbm_to_vmem [thread:$0]  %s1102_s0, 4096, %s16_s13, [#allocation5], %s917_s22, %s917_s22, %s918_s23  }
  0x12   :  { %912 = dma.done.wait [#allocation5], 4096  }
  0x13   :  { %913 = vsyncadd [#allocation5], 4294963200  ;;  %v73_v0 = vld [vmem:[#allocation4 + $0x80] sm:$0xff]  ;;  %v186_v1 = vld [vmem:[#allocation4 + $0x88] sm:$0xff]  ;;  %vm920_vm0 = vmmov 0   ;;  %vm432_vm1 = vcmask 130112  }
  0x14   :  { %v65_v2 = vld [vmem:[#allocation4] sm:$0xff]  ;;  %v218_v3 = vadd.f32 %v186_v1, %v73_v0  ;;  %v178_v4 = vld [vmem:[#allocation4 + $0x8] sm:$0xff]  ;;  %v74_v5 = vld [vmem:[#allocation4 + $0x90] sm:$0xff]  ;;  %v266_v27 = vmax.f32 %v73_v0, %v186_v1  ;;  %vm439_vm2 = vcmask 195712   ;;  %vm446_vm3 = vcmask 261312   ;;  %s922_s15 = smov [#allocation7]  }
  0x15   :  { %v187_v6 = vld [vmem:[#allocation4 + $0x98] sm:$0xff]  ;;  %v210_v7 = vadd.f32 %v178_v4, %v65_v2  ;;  %v66_v8 = vld [vmem:[#allocation4 + $0x10] sm:$0xff]  ;;  %v75_v12 = vld [vmem:[#allocation4 + $0xa0] sm:$0xff]  ;;  %v258_v25 = vmax.f32 %v65_v2, %v178_v4  ;;  %vm453_vm4 = vcmask 326912   ;;  %vm460_vm5 = vcmask 392512   ;;  %s797_s16 = sshll.u32 %s922_s15, 4  ;;  %s798_s16 = int_to_ptr.vmem [resolvable:$true] %s797_s16 }
  0x16   :  { %v179_v9 = vld [vmem:[#allocation4 + $0x18] sm:$0xff]  ;;  %325 = vadd.xlane.f32.xlu1 %v218_v3  ;;  %v219_v10 = vadd.f32 %v187_v6, %v74_v5  ;;  %v188_v13 = vld [vmem:[#allocation4 + $0xa8] sm:$0xff]  ;;  %v67_v14 = vld [vmem:[#allocation4 + $0x20] sm:$0xff]  ;;  %v267_v26 = vmax.f32 %v74_v5, %v187_v6  ;;  %v919_v3 = vmov 0.0|0.0   ;;  %vm467_vm6 = vcmask 458112   ;;  %p895_p9 = scmp.lt.s32.totalorder %s798_s16, %s798_s16 }
  0x17   :  { %309 = vadd.xlane.f32.xlu0 %v210_v7  ;;  %v211_v11 = vadd.f32 %v179_v9, %v66_v8  ;;  %v180_v15 = vld [vmem:[#allocation4 + $0x28] sm:$0xff]  ;;  %v220_v16 = vadd.f32 %v188_v13, %v75_v12  ;;  %v76_v18 = vld [vmem:[#allocation4 + $0xb0] sm:$0xff]  ;;  %v189_v19 = vld [vmem:[#allocation4 + $0xb8] sm:$0xff]  ;;  %v259_v24 = vmax.f32 %v66_v8, %v179_v9  ;;  %v268_v34 = vmax.f32 %v75_v12, %v188_v13 }
  0x18   :  { %v212_v17 = vadd.f32 %v180_v15, %v67_v14  ;;  %v68_v20 = vld [vmem:[#allocation4 + $0x30] sm:$0xff]  ;;  %v181_v21 = vld [vmem:[#allocation4 + $0x38] sm:$0xff]  ;;  %v221_v22 = vadd.f32 %v189_v19, %v76_v18  ;;  %v77_v28 = vld [vmem:[#allocation4 + $0xc0] sm:$0xff]  ;;  %v260_v35 = vmax.f32 %v67_v14, %v180_v15  ;;  %v269_v42 = vmax.f32 %v76_v18, %v189_v19  ;;  %845 = vmatprep.subr.bf16.mxu0 %v919_v3 }
  0x19   :  { %v213_v23 = vadd.f32 %v181_v21, %v68_v20  ;;  %v190_v29 = vld [vmem:[#allocation4 + $0xc8] sm:$0xff]  ;;  %v69_v30 = vld [vmem:[#allocation4 + $0x40] sm:$0xff]  ;;  %v78_v36 = vld [vmem:[#allocation4 + $0xd0] sm:$0xff]  ;;  %v261_v43 = vmax.f32 %v68_v20, %v181_v21  ;;  %v921_v13 = vmov 0.0   ;;  %vm474_vm7 = vcmask 523712  }
  0x1a   :  { %327 = vadd.xlane.f32.xlu1 %v219_v10  ;;  %v182_v31 = vld [vmem:[#allocation4 + $0x48] sm:$0xff]  ;;  %v222_v32 = vadd.f32 %v190_v29, %v77_v28  ;;  %v191_v37 = vld [vmem:[#allocation4 + $0xd8] sm:$0xff]  ;;  %v70_v38 = vld [vmem:[#allocation4 + $0x50] sm:$0xff]  ;;  %v270_v50 = vmax.f32 %v77_v28, %v190_v29  ;;  %837 = vmatprep.mubr.msk.f32.mxu0 %vm920_vm0, %v921_v13  ;;  %vm515_vm8 = vcmask 1041409   ;;  %vm612_vm9 = vcmask 1043459  }
  0x1b   :  { %311 = vadd.xlane.f32.xlu0 %v211_v11  ;;  %v214_v33 = vadd.f32 %v182_v31, %v69_v30  ;;  %v183_v39 = vld [vmem:[#allocation4 + $0x58] sm:$0xff]  ;;  %v223_v40 = vadd.f32 %v191_v37, %v78_v36  ;;  %v79_v44 = vld [vmem:[#allocation4 + $0xe0] sm:$0xff]  ;;  %v192_v45 = vld [vmem:[#allocation4 + $0xe8] sm:$0xff]  ;;  %v262_v51 = vmax.f32 %v69_v30, %v182_v31  ;;  %v271_v58 = vmax.f32 %v78_v36, %v191_v37 }
  0x1c   :  { %v215_v41 = vadd.f32 %v183_v39, %v70_v38  ;;  %v71_v46 = vld [vmem:[#allocation4 + $0x60] sm:$0xff]  ;;  %v184_v47 = vld [vmem:[#allocation4 + $0x68] sm:$0xff]  ;;  %v224_v48 = vadd.f32 %v192_v45, %v79_v44  ;;  %v80_v52 = vld [vmem:[#allocation4 + $0xf0] sm:$0xff]  ;;  %v263_v59 = vmax.f32 %v70_v38, %v183_v39  ;;  %v272_v60 = vmax.f32 %v79_v44, %v192_v45  ;;  %840 = vmatprep.subr.mxu1 %v921_v13 }
  0x1d   :  { %v216_v49 = vadd.f32 %v184_v47, %v71_v46  ;;  %v193_v53 = vld [vmem:[#allocation4 + $0xf8] sm:$0xff]  ;;  %v72_v54 = vld [vmem:[#allocation4 + $0x70] sm:$0xff]  ;;  %v264_v61 = vmax.f32 %v71_v46, %v184_v47  ;;  %v617_v0 = vld [vmem:[%s1103_s1] sm:$0xff]  ;;  %842 = vmatprep.mubr.msk.f32.mxu1 %vm920_vm0, %v921_v13  ;;  %v421_v30 = vlaneseq  ;;  %vm615_vm10 = vcmask 1041408  }
  0x1e   :  { %329 = vadd.xlane.f32.xlu1 %v220_v16  ;;  %v185_v55 = vld [vmem:[#allocation4 + $0x78] sm:$0xff]  ;;  %v225_v56 = vadd.f32 %v193_v53, %v80_v52  ;;  %v273_v62 = vmax.f32 %v80_v52, %v193_v53  ;;  %v618_v1 = vld [vmem:[%s1103_s1 + $0x8] sm:$0xff]  ;;  %v619_v4 = vld [vmem:[%s1103_s1 + $0x10] sm:$0xff]  ;;  %vm626_vm11 = vcmask 523264   ;;  %vm705_vm12 = vcmask 1043456  }
  0x1f   :  { %313 = vadd.xlane.f32.xlu0 %v212_v17  ;;  %v217_v57 = vadd.f32 %v185_v55, %v72_v54  ;;  %v265_v63 = vmax.f32 %v72_v54, %v185_v55  ;;  %v846_v2 = vpack.c.bf16 %v618_v1, %v617_v0  ;;  %v620_v5 = vld [vmem:[%s1103_s1 + $0x18] sm:$0xff]  ;;  %v621_v7 = vld [vmem:[%s1103_s1 + $0x20] sm:$0xff]  ;;  %v622_v8 = vld [vmem:[%s1103_s1 + $0x28] sm:$0xff]  ;;  %vm701_vm13 = vcmask 31744  }
  0x20   :  { %v849_v6 = vpack.c.bf16 %v620_v5, %v619_v4  ;;  %v852_v9 = vpack.c.bf16 %v622_v8, %v621_v7  ;;  %v623_v10 = vld [vmem:[%s1103_s1 + $0x30] sm:$0xff]  ;;  %v624_v11 = vld [vmem:[%s1103_s1 + $0x38] sm:$0xff]  ;;  %vm789_vm14 = vcmask 517120  }
  0x21   :  { %847 = vmatpush3.bf16.msra.mxu0 %v846_v2  ;;  %v855_v12 = vpack.c.bf16 %v624_v11, %v623_v10 }
  0x22   :  { %331 = vadd.xlane.f32.xlu1 %v221_v22  ;;  %848 = vmatprep.subr.bf16.mxu0 %v919_v3 }
  0x23   :  { %315 = vadd.xlane.f32.xlu0 %v213_v23 }
  0x25   :  { %850 = vmatpush3.bf16.msra.mxu0 %v849_v6 }
  0x26   :  { %375 = vmax.xlane.f32.xlu1 %v259_v24  ;;  %851 = vmatprep.subr.bf16.mxu0 %v919_v3 }
  0x27   :  { %373 = vmax.xlane.f32.xlu0 %v258_v25 }
  0x29   :  { %853 = vmatpush3.bf16.msra.mxu0 %v852_v9 }
  0x2a   :  { %391 = vmax.xlane.f32.xlu1 %v267_v26  ;;  %854 = vmatprep.subr.bf16.mxu0 %v919_v3 }
  0x2b   :  { %389 = vmax.xlane.f32.xlu0 %v266_v27 }
  0x2d   :  { %856 = vmatpush3.bf16.msra.mxu0 %v855_v12 }
  0x2e   :  { %333 = vadd.xlane.f32.xlu1 %v222_v32 }
  0x2f   :  { %317 = vadd.xlane.f32.xlu0 %v214_v33  ;;  %v422_v33 = vand.u32 127, %v421_v30 }
  0x31   :  { %v427_v36 = vadd.s32 4294967288, %v422_v33  ;;  %v434_v37 = vadd.s32 4294967280, %v422_v33  ;;  %v441_v39 = vadd.s32 4294967272, %v422_v33  ;;  %v448_v47 = vadd.s32 4294967264, %v422_v33 }
  0x32   :  { %393 = vmax.xlane.f32.xlu1 %v268_v34  ;;  %v424_v34 = vshrl.u32 %v421_v30, 7  ;;  %v462_v52 = vadd.s32 4294967248, %v422_v33 }
  0x33   :  { %377 = vmax.xlane.f32.xlu0 %v260_v35 }
  0x34   :  { %v999_v44 = vsub.s32 %v434_v37, %v424_v34  ;;  %v1015_v4 = vsub.s32 %v462_v52, %v424_v34 }
  0x36   :  { %335 = vadd.xlane.f32.xlu1 %v223_v40  ;;  %v995_v40 = vsub.s32 %v422_v33, %v424_v34 }
  0x37   :  { %319 = vadd.xlane.f32.xlu0 %v215_v41 }
  0x3a   :  { %395 = vmax.xlane.f32.xlu1 %v269_v42  ;;  %v997_v42 = vsub.s32 %v427_v36, %v424_v34 }
  0x3b   :  { %379 = vmax.xlane.f32.xlu0 %v261_v43 }
  0x3e   :  { %337 = vadd.xlane.f32.xlu1 %v224_v48  ;;  %v455_v48 = vadd.s32 4294967256, %v422_v33 }
  0x3f   :  { %321 = vadd.xlane.f32.xlu0 %v216_v49 }
  0x40   :  { %v1011_v0 = vsub.s32 %v455_v48, %v424_v34 }
  0x42   :  { %397 = vmax.xlane.f32.xlu1 %v270_v50 }
  0x43   :  { %381 = vmax.xlane.f32.xlu0 %v262_v51  ;;  %v1001_v51 = vsub.s32 %v441_v39, %v424_v34 }
  0x46   :  { %339 = vadd.xlane.f32.xlu1 %v225_v56 }
  0x47   :  { %323 = vadd.xlane.f32.xlu0 %v217_v57  ;;  %v469_v57 = vadd.s32 4294967240, %v422_v33 }
  0x49   :  { %v1020_v8 = vsub.s32 %v469_v57, %v424_v34 }
  0x4a   :  { %399 = vmax.xlane.f32.xlu1 %v271_v58 }
  0x4b   :  { %383 = vmax.xlane.f32.xlu0 %v263_v59 }
  0x4e   :  { %401 = vmax.xlane.f32.xlu1 %v272_v60 }
  0x4f   :  { %385 = vmax.xlane.f32.xlu0 %v264_v61 }
  0x52   :  { %403 = vmax.xlane.f32.xlu1 %v273_v62  ;;  %v1009_v62 = vsub.s32 %v448_v47, %v424_v34 }
  0x53   :  { %387 = vmax.xlane.f32.xlu0 %v265_v63 }
  0xa3   :  { %v326_v14 = vpop.xlane.xlu1 %325 }
  0xa4   :  { %v310_v15 = vpop.xlane.xlu0 %309  ;;  %v349_v49 = vmul.f32 0.00390625, %v326_v14 }
  0xa5   :  { %v341_v53 = vmul.f32 0.00390625, %v310_v15 }
  0xa6   :  { %v479_v1 = vrot.slane %v349_v49, %v995_v40 }
  0xa7   :  { %v328_v16 = vpop.xlane.xlu1 %327  ;;  %v426_v5 = vrot.slane %v341_v53, %v995_v40 }
  0xa8   :  { %v312_v17 = vpop.xlane.xlu0 %311  ;;  %v350_v43 = vmul.f32 0.00390625, %v328_v16 }
  0xa9   :  { %v342_v46 = vmul.f32 0.00390625, %v312_v17 }
  0xaa   :  { %v483_v58 = vrot.slane %v350_v43, %v997_v42 }
  0xab   :  { %v330_v18 = vpop.xlane.xlu1 %329  ;;  %v431_v61 = vrot.slane %v342_v46, %v997_v42 }
  0xac   :  { %v314_v19 = vpop.xlane.xlu0 %313  ;;  %v351_v50 = vmul.f32 0.00390625, %v330_v18  ;;  %v484_v10 = vsel %vm432_vm1, %v483_v58, %v479_v1 }
  0xad   :  { %v343_v54 = vmul.f32 0.00390625, %v314_v19  ;;  %v433_v15 = vsel %vm432_vm1, %v431_v61, %v426_v5 }
  0xae   :  { %v488_v2 = vrot.slane %v351_v50, %v999_v44 }
  0xaf   :  { %v332_v20 = vpop.xlane.xlu1 %331  ;;  %v438_v6 = vrot.slane %v343_v54, %v999_v44 }
  0xb0   :  { %v316_v21 = vpop.xlane.xlu0 %315  ;;  %v352_v55 = vmul.f32 0.00390625, %v332_v20  ;;  %v489_v19 = vsel %vm439_vm2, %v488_v2, %v484_v10 }
  0xb1   :  { %v344_v59 = vmul.f32 0.00390625, %v316_v21 }
  0xb2   :  { %v493_v7 = vrot.slane %v352_v55, %v1001_v51 }
  0xb3   :  { %v979_v22 = vpop.xlane.xlu1 %375  ;;  %v445_v11 = vrot.slane %v344_v59, %v1001_v51 }
  0xb4   :  { %v981_v23 = vpop.xlane.xlu0 %373  ;;  %v541_v12 = vrot.slane %v979_v22, %v997_v42 }
  0xb5   :  { %v537_v13 = vrot.slane %v981_v23, %v995_v40  ;;  %v440_v23 = vsel %vm439_vm2, %v438_v6, %v433_v15 }
  0xb7   :  { %v983_v24 = vpop.xlane.xlu1 %391 }
  0xb8   :  { %v985_v25 = vpop.xlane.xlu0 %389  ;;  %v580_v16 = vrot.slane %v983_v24, %v997_v42  ;;  %v447_v24 = vsel %vm446_vm3, %v445_v11, %v440_v23 }
  0xb9   :  { %v576_v17 = vrot.slane %v985_v25, %v995_v40  ;;  %v542_v25 = vsel %vm432_vm1, %v541_v12, %v537_v13 }
  0xbb   :  { %v334_v26 = vpop.xlane.xlu1 %333  ;;  %v581_v39 = vsel %vm432_vm1, %v580_v16, %v576_v17  ;;  %v625_v16 = vld [vmem:[%s1104_s2] sm:$0xf]  ;;  %s890_s2 = scalar_lea.vmem %s798_s16, 32 }
  0xbc   :  { %v318_v27 = vpop.xlane.xlu0 %317  ;;  %v353_v63 = vmul.f32 0.00390625, %v334_v26  ;;  %v494_v26 = vsel %vm446_vm3, %v493_v7, %v489_v19  ;;  %841 = vmatpush3.msk.msra.mxu1 %vm705_vm12, %v625_v16  ;;  %p891_p8 = scmp.ne.s32.totalorder %s798_s16, %s890_s2  ;;  %p896_p10 = scmp.lt.s32.totalorder %s890_s2, %s890_s2 }
  0xbd   :  { %v345_v3 = vmul.f32 0.00390625, %v318_v27 }
  0xbe   :  { %v498_v18 = vrot.slane %v353_v63, %v1009_v62  ;;  %p897_p11 = por %p896_p10, %p895_p9 }
  0xbf   :  { %v987_v28 = vpop.xlane.xlu1 %393  ;;  %v452_v20 = vrot.slane %v345_v3, %v1009_v62 }
  0xc0   :  { %v989_v29 = vpop.xlane.xlu0 %377  ;;  %v585_v34 = vrot.slane %v987_v28, %v999_v44  ;;  %p898_p12 = pnand %p897_p11, %p891_p8 }
  0xc2   :  { %v586_v48 = vsel %vm439_vm2, %v585_v34, %v581_v39 }
  0xc3   :  { %v336_v31 = vpop.xlane.xlu1 %335 }
  0xc4   :  { %v320_v32 = vpop.xlane.xlu0 %319  ;;  %v354_v21 = vmul.f32 0.00390625, %v336_v31  ;;  %v499_v31 = vsel %vm453_vm4, %v498_v18, %v494_v26 }
  0xc5   :  { %v346_v22 = vmul.f32 0.00390625, %v320_v32  ;;  %v546_v32 = vrot.slane %v989_v29, %v999_v44 }
  0xc6   :  { %v503_v42 = vrot.slane %v354_v21, %v1011_v0 }
  0xc7   :  { %v991_v35 = vpop.xlane.xlu1 %395  ;;  %v459_v43 = vrot.slane %v346_v22, %v1011_v0 }
  0xc8   :  { %v993_v38 = vpop.xlane.xlu0 %379  ;;  %v590_v28 = vrot.slane %v991_v35, %v1001_v51  ;;  %v504_v55 = vsel %vm460_vm5, %v503_v42, %v499_v31 }
  0xca   :  { %v591_v57 = vsel %vm446_vm3, %v590_v28, %v586_v48 }
  0xcb   :  { %v338_v41 = vpop.xlane.xlu1 %337 }
  0xcc   :  { %v322_v45 = vpop.xlane.xlu0 %321  ;;  %v355_v27 = vmul.f32 0.00390625, %v338_v41  ;;  %v454_v41 = vsel %vm453_vm4, %v452_v20, %v447_v24 }
  0xcd   :  { %v347_v30 = vmul.f32 0.00390625, %v322_v45  ;;  %v551_v45 = vrot.slane %v993_v38, %v1001_v51  ;;  %v547_v38 = vsel %vm439_vm2, %v546_v32, %v542_v25 }
  0xce   :  { %v508_v46 = vrot.slane %v355_v27, %v1015_v4 }
  0xcf   :  { %v1003_v56 = vpop.xlane.xlu1 %397  ;;  %v466_v47 = vrot.slane %v347_v30, %v1015_v4  ;;  %v552_v59 = vsel %vm446_vm3, %v551_v45, %v547_v38 }
  0xd0   :  { %v1006_v60 = vpop.xlane.xlu0 %381  ;;  %v595_v29 = vrot.slane %v1003_v56, %v1009_v62  ;;  %v461_v56 = vsel %vm460_vm5, %v459_v43, %v454_v41 }
  0xd1   :  { %v556_v49 = vrot.slane %v1006_v60, %v1009_v62  ;;  %v509_v60 = vsel %vm467_vm6, %v508_v46, %v504_v55  ;;  %v468_v61 = vsel %vm467_vm6, %v466_v47, %v461_v56 }
  0xd2   :  { %v596_v62 = vsel %vm453_vm4, %v595_v29, %v591_v57 }
  0xd3   :  { %v340_v9 = vpop.xlane.xlu1 %339 }
  0xd4   :  { %v324_v14 = vpop.xlane.xlu0 %323  ;;  %v356_v36 = vmul.f32 0.00390625, %v340_v9 }
  0xd5   :  { %v348_v40 = vmul.f32 0.00390625, %v324_v14 }
  0xd6   :  { %v513_v50 = vrot.slane %v356_v36, %v1020_v8 }
  0xd7   :  { %v400_v33 = vpop.xlane.xlu1 %399  ;;  %v473_v51 = vrot.slane %v348_v40, %v1020_v8 }
  0xd8   :  { %v384_v37 = vpop.xlane.xlu0 %383  ;;  %v600_v35 = vrot.slane %v400_v33, %v1011_v0  ;;  %v514_v1 = vsel %vm474_vm7, %v513_v50, %v509_v60 }
  0xd9   :  { %v561_v53 = vrot.slane %v384_v37, %v1011_v0  ;;  %v557_v0 = vsel %vm453_vm4, %v556_v49, %v552_v59 }
  0xda   :  { %v601_v2 = vsel %vm460_vm5, %v600_v35, %v596_v62 }
  0xdb   :  { %v402_v44 = vpop.xlane.xlu1 %401  ;;  %v562_v6 = vsel %vm460_vm5, %v561_v53, %v557_v0 }
  0xdc   :  { %v386_v52 = vpop.xlane.xlu0 %385  ;;  %v605_v54 = vrot.slane %v402_v44, %v1015_v4 }
  0xdd   :  { %v566_v58 = vrot.slane %v386_v52, %v1015_v4  ;;  %v475_v4 = vsel %vm474_vm7, %v473_v51, %v468_v61 }
  0xde   :  { %v606_v7 = vsel %vm467_vm6, %v605_v54, %v601_v2  ;;  %v516_v13 = vsel %vm515_vm8, %v514_v1, %v475_v4 }
  0xdf   :  { %v404_v63 = vpop.xlane.xlu1 %403  ;;  %v567_v10 = vsel %vm467_vm6, %v566_v58, %v562_v6 }
  0xe0   :  { %v610_v3 = vrot.slane %v404_v63, %v1020_v8  ;;  %v388_v5 = vpop.xlane.xlu0 %387 }
  0xe1   :  { %v571_v9 = vrot.slane %v388_v5, %v1020_v8 }
  0xe2   :  { %v611_v11 = vsel %vm474_vm7, %v610_v3, %v606_v7 }
  0xe3   :  { %v572_v12 = vsel %vm474_vm7, %v571_v9, %v567_v10 }
  0xe4   :  { %v613_v14 = vsel %vm612_vm9, %v611_v11, %v572_v12 }
  0xe5   :  { %v616_v15 = vsel %vm615_vm10, %v516_v13, %v613_v14 }
  0xe6   :  { %838 = vmatmul.mubr.msk.f32.vlgmr.msra.gmra.mrb[0].mxu0 %vm626_vm11, %v616_v15 }
 0x1b9   :  { %v696_v8 = vpop.f32.mrb[0].mxu0 }
 0x1ba   :  { %v700_v17 = vmax.f32 %v696_v8, 0.0  ;;  %v839_v18 = vpop.f32.mrb[1].mxu0 }
 0x1bc   :  { %843 = vmatmul.mubr.msk.f32.vlgmr.msra.gmra.mrb[0].mxu1 %vm701_vm13, %v700_v17 }
 0x28f   :  { %v775_v19 = vpop.f32.mrb[0].mxu1 }
 0x290   :  { %v780_v20 = vrot.slane %v775_v19, 2  ;;  %v844_v21 = vpop.f32.mrb[1].mxu1 }
 0x292   :  { %v782_v22 = vadd.f32 %v780_v20, %v775_v19 }
 0x294   :  { %v809_v23 = vmul.f32 -1.442695, %v782_v22 }
 0x296   :  { %864 = vpow2.f32 %v809_v23 }
 0x2a0   :  { %v865_v26 = vpop.eup %864 }
 0x2a1   :  { %v786_v27 = vadd.f32 1.0, %v865_v26 }
 0x2a3   :  { %866 = vrcp.f32 %v786_v27 }
 0x2ad   :  { %v867_v30 = vpop.eup %866 }
 0x2ae   :  { %790 = vst.msk [vmem:[#allocation7] sm:$0x3] %vm789_vm14, %v867_v30 }
 0x2af   :  { %901 = shalt.err (!%p898_p12)
}
 0x2b0   :  { %s902_s19 = scalar_lea.hbm %s1105_s3, 32 }
 0x2b1   :  { %p903_p13 = scmp.ne.s32.totalorder %s1105_s3, %s902_s19  ;;  %p906_p0 = scmp.lt.u32.totalorder %s902_s19, %s1105_s3 }
 0x2b3   :  { %p908_p1 = pnand %p906_p0, %p903_p13 }
 0x2b5   :  { %911 = shalt.err (!%p908_p1)
}
 0x2b6   :  { %800 = dma.vmem_to_hbm [thread:$0]  %s798_s16, 32, %s1105_s3, [#allocation6]  }
 0x2b7   :  { %914 = dma.done.wait [#allocation6], 32  }
 0x2b8   :  { %915 = vsyncadd [#allocation6], 4294967264 }
 0x2b9   :  { %804 = vsyncpa [#allocation5], 1 }
 0x2ba   :  { %805 = vsyncpa [#allocation6], 1 }

</bundles_post_ra>
